<compile_context>
chip_gen: v6e
topology: v6e:2x2x1
jax: 0.10.0
libtpu: 0.0.40
codegen_flags: <defaults>
</compile_context>

<pallas_src>
import functools

import jax
import jax.numpy as jnp
from jax.experimental import pallas as pl
from jax.experimental.pallas import tpu as pltpu


def _round_up(x, m):
    return (x + m - 1) // m * m


# --------------------------------------------------------------------------
# Hardware-aware sizing helpers
# --------------------------------------------------------------------------
def _vmem_capacity():
    try:
        return int(pltpu.get_tpu_info().vmem_capacity_bytes)
    except Exception:
        return 64 * 1024 * 1024  # conservative (v7x-sized) default


def _tile_budget(cap):
    # ~half of physical VMEM on 128 MiB parts (v5e/v6e); tighter on 64 MiB
    # parts (v7x) to leave headroom for compiler-internal scratch.
    if cap >= 100 * 1024 * 1024:
        return 56 * 1024 * 1024
    return 28 * 1024 * 1024


def _vmem_limit(estimate, cap):
    want = max(32 * 1024 * 1024, int(1.4 * estimate) + (8 << 20))
    return int(min(want, cap - (12 << 20)))


def _pick_tm(M, cap):
    """M tile: multiple of 8, <= cap, preferably dividing M (no padding) and
    preferably leaving >= 2 grid steps (v7x has 2 TensorCores per chip)."""
    cap = max(8, min(cap, M))
    cap -= cap % 8
    cap = max(cap, 8)
    for tm in range(cap, 7, -8):          # divisor + >=2 steps
        if M % tm == 0 and (M // tm >= 2 or M <= 8):
            return tm, M
    for tm in range(cap, 7, -8):          # divisor only
        if M % tm == 0:
            return tm, M
    return cap, _round_up(M, cap)          # escape hatch: pad M


# --------------------------------------------------------------------------
# Kernels
# --------------------------------------------------------------------------
def _resident_kernel(p_ref, w_ref, b_ref, o_ref):
    """Whole (K, N) weight + bias resident in VMEM; one dot + bias per M tile.
    f32 accumulation happens on the MXU via preferred_element_type."""
    o_ref[...] = (
        jnp.dot(p_ref[...], w_ref[...], preferred_element_type=jnp.float32)
        + b_ref[...]
    ).astype(o_ref.dtype)


def _acc_kernel(p_ref, w_ref, b_ref, o_ref, acc_ref):
    """K-tiled fallback: grid = (M tiles, N tiles, K tiles); K is innermost."""
    k = pl.program_id(2)

    @pl.when(k == 0)
    def _():
        # Initialize the accumulator with the bias (saves the separate
        # zero-fill + bias add from the previous version).
        acc_ref[...] = jnp.broadcast_to(b_ref[...], acc_ref.shape).astype(jnp.float32)

    acc_ref[...] += jnp.dot(
        p_ref[...], w_ref[...], preferred_element_type=jnp.float32
    )

    @pl.when(k == pl.num_programs(2) - 1)
    def _():
        o_ref[...] = acc_ref[...].astype(o_ref.dtype)


# --------------------------------------------------------------------------
# Matmul + bias dispatcher
# --------------------------------------------------------------------------
def _matmul_bias(patches, weight, bias, out_dtype):
    """patches: (M, K) bf16; weight: (K, N) bf16; bias: (1, N) f32 -> (M, N)."""
    M, K = patches.shape
    _, N = weight.shape
    in_b = patches.dtype.itemsize
    w_b = weight.dtype.itemsize
    out_b = jnp.dtype(out_dtype).itemsize

    cap = _vmem_capacity()
    tile_budget = _tile_budget(cap)

    # ---- Path A: weight fully resident in VMEM (typical for PatchEmbed) ----
    w_bytes = 2 * K * N * w_b + 2 * N * 4          # x2: pipeline buffer pair
    if w_bytes <= tile_budget // 2:
        per_row = 2 * K * in_b + 2 * N * out_b     # patches + out, double-buffered
        tm_cap = max(8, min(2048, (tile_budget - w_bytes) // per_row))
        tm, M_pad = _pick_tm(M, tm_cap)
        if M_pad != M:
            patches = jnp.pad(patches, ((0, M_pad - M), (0, 0)))
        grid = (M_pad // tm,)
        vmem_limit = _vmem_limit(w_bytes + tm * per_row, cap)

        out = pl.pallas_call(
            _resident_kernel,
            out_shape=jax.ShapeDtypeStruct((M_pad, N), out_dtype),
            grid_spec=pltpu.PrefetchScalarGridSpec(
                num_scalar_prefetch=0,
                grid=grid,
                in_specs=[
                    pl.BlockSpec((tm, K), lambda i: (i, 0)),   # patches tile
                    pl.BlockSpec((K, N), lambda i: (0, 0)),    # resident weight
                    pl.BlockSpec((1, N), lambda i: (0, 0)),    # resident bias
                ],
                out_specs=pl.BlockSpec((tm, N), lambda i: (i, 0)),
            ),
            compiler_params=pltpu.CompilerParams(
                dimension_semantics=("parallel",),
                vmem_limit_bytes=vmem_limit,
            ),
        )(patches, weight, bias)
        return out[:M] if M_pad != M else out

    # ---- Path B: K-tiled accumulation (weight too large to stay resident) ----
    N_pad = _round_up(N, 128)
    if N_pad != N:  # rare corner: large but lane-unaligned embed dim
        weight = jnp.pad(weight, ((0, 0), (0, N_pad - N)))
        bias = jnp.pad(bias, ((0, 0), (0, N_pad - N)))

    tm, M_pad = _pick_tm(M, 512)
    if M_pad != M:
        patches = jnp.pad(patches, ((0, M_pad - M), (0, 0)))

    def est(tk, tn):
        return (2 * tm * tk * in_b + 2 * tk * tn * w_b
                + 2 * tm * tn * out_b + tm * tn * 4 + 2 * tn * 4)

    tn = tk = None
    for cand_tn in (N_pad, 2048, 1024, 512, 256, 128):
        if cand_tn > N_pad or N_pad % cand_tn:
            continue
        for cand_tk in (2048, 1024, 512, 256, 128):
            if cand_tk <= K and K % cand_tk == 0 and est(cand_tk, cand_tn) <= tile_budget:
                tn, tk = cand_tn, cand_tk
                break
        if tn is not None:
            break
    if tn is None:  # escape hatch for odd shapes
        tn = 128 if N_pad % 128 == 0 else N_pad
        tk = 128 if K % 128 == 0 else K

    grid = (M_pad // tm, N_pad // tn, K // tk)
    vmem_limit = _vmem_limit(est(tk, tn), cap)

    out = pl.pallas_call(
        _acc_kernel,
        out_shape=jax.ShapeDtypeStruct((M_pad, N_pad), out_dtype),
        grid_spec=pltpu.PrefetchScalarGridSpec(
            num_scalar_prefetch=0,
            grid=grid,
            in_specs=[
                pl.BlockSpec((tm, tk), lambda i, j, k: (i, k)),
                pl.BlockSpec((tk, tn), lambda i, j, k: (k, j)),
                pl.BlockSpec((1, tn), lambda i, j, k: (0, j)),
            ],
            out_specs=pl.BlockSpec((tm, tn), lambda i, j, k: (i, j)),
            scratch_shapes=[pltpu.VMEM((tm, tn), jnp.float32)],
        ),
        compiler_params=pltpu.CompilerParams(
            dimension_semantics=("parallel", "parallel", "arbitrary"),
            vmem_limit_bytes=vmem_limit,
        ),
    )(patches, weight, bias)
    return out[:M, :N]


# --------------------------------------------------------------------------
# Forward
# --------------------------------------------------------------------------
@functools.partial(jax.jit, static_argnames=("patch_size", "grid_size", "embed_dim"))
def patch_embed_forward(x, w_mat, bias2d, *, patch_size, grid_size, embed_dim):
    B, C, H, W, D = x.shape
    ph, pw, pd = patch_size
    Gh, Gw, Gd = grid_size
    L = Gh * Gw * Gd
    out_dtype = x.dtype

    # bf16 MXU input BEFORE the extraction transpose: halves that pass's HBM
    # write.  (Inputs are quantized to bf16; accumulation stays f32 in-kernel.)
    xb = x.astype(jnp.bfloat16)

    # Patch extraction (plain JAX, same jit as the matmul).
    # TODO(synk): folding this gather into the Pallas kernel would require an
    # in-VMEM regroup of pd-wide (2-8 element) depth slivers into lane-major K
    # rows; with pd << 128 lanes that relayout under-fills vregs and ends up
    # slower than this single fused XLA transpose pass, so only the bf16-first
    # mitigation from the review is applied here.
    xp = xb.reshape(B, C, Gh, ph, Gw, pw, Gd, pd)
    xp = xp.transpose(0, 2, 4, 6, 1, 3, 5, 7)          # (B,Gh,Gw,Gd,C,ph,pw,pd)
    patches = xp.reshape(B * L, C * ph * pw * pd)      # (M, K) bf16

    out = _matmul_bias(patches, w_mat, bias2d, out_dtype)   # (M, N)
    # == conv(x).flatten(2).transpose(1, 2)
    return out.reshape(B, L, embed_dim)


class PatchEmbed3D:
    """JAX/Pallas re-implementation of the PyTorch PatchEmbed (flatten=True)."""

    def __init__(self, img_size, patch_size, in_chans, embed_dim, key):
        self.img_size = (img_size,) * 3
        self.patch_size = (patch_size,) * 3
        self.grid_size = tuple(s // p for s, p in zip(self.img_size, self.patch_size))
        self.num_patches = self.grid_size[0] * self.grid_size[1] * self.grid_size[2]
        self.in_chans = in_chans
        self.embed_dim = embed_dim

        kw, kb = jax.random.split(key)
        # Conv3d weight layout: (embed_dim, in_chans, ps, ps, ps); bias: (embed_dim,)
        fan_in = in_chans * patch_size ** 3
        bound = 1.0 / (fan_in ** 0.5)
        self.weight = jax.random.uniform(
            kw, (embed_dim, in_chans, patch_size, patch_size, patch_size),
            minval=-bound, maxval=bound, dtype=jnp.float32)
        self.bias = jax.random.uniform(
            kb, (embed_dim,), minval=-bound, maxval=bound, dtype=jnp.float32)

        # Matmul-ready parameters prepared ONCE at construction (perf review):
        # flatten the conv weight to (K, N) in the same (C, kh, kw, kd) order as
        # the patch flattening and cast to bf16; bias kept f32 as (1, N).
        self.w_mat = jnp.asarray(
            self.weight.reshape(embed_dim, -1).T, dtype=jnp.bfloat16)   # (K, N)
        self.bias2d = jnp.asarray(
            self.bias.reshape(1, embed_dim), dtype=jnp.float32)         # (1, N)

    def __call__(self, x):
        assert x.shape[2:] == self.img_size, "input size mismatch"
        return patch_embed_forward(
            x, self.w_mat, self.bias2d,
            patch_size=self.patch_size,
            grid_size=self.grid_size,
            embed_dim=self.embed_dim)


def _reference(x, weight, bias, patch):
    """Pure-JAX reference: Conv3d(stride=kernel) + flatten + transpose (f32)."""
    out = jax.lax.conv_general_dilated(
        x, weight,
        window_strides=(patch, patch, patch),
        padding="VALID",
        dimension_numbers=("NCHWD", "OIHWD", "NCHWD"),
    )
    out = out + bias.reshape(1, -1, 1, 1, 1)
    B, E = out.shape[0], out.shape[1]
    return out.reshape(B, E, -1).transpose(0, 2, 1)


if __name__ == "__main__":
    key = jax.random.PRNGKey(0)
    k_x, k_p = jax.random.split(key)

    B, C, IMG, PATCH, EMBED = 2, 4, 16, 8, 32
    x = jax.random.normal(k_x, (B, C, IMG, IMG, IMG), dtype=jnp.float32)

    pe = PatchEmbed3D(img_size=IMG, patch_size=PATCH, in_chans=C,
                      embed_dim=EMBED, key=k_p)

    out = jax.block_until_ready(pe(x))

    ref = _reference(x, pe.weight, pe.bias, PATCH)
    assert out.shape == (B, pe.num_patches, EMBED), out.shape
    # bf16 MXU inputs with f32 accumulation -> loosened tolerance vs f32 conv ref.
    assert jnp.allclose(out, ref, atol=3e-2, rtol=3e-2), "mismatch vs reference"

    print("KERNEL_OK")
</pallas_src>

<mosaic_0001>
module attributes {stable_mosaic.version = 11 : i64} {
  func.func @_resident_kernel(%arg0: i32, %arg1: memref<8x2048xbf16, #tpu.memory_space<vmem>>, %arg2: memref<2048x32xbf16, #tpu.memory_space<vmem>>, %arg3: memref<1x32xf32, #tpu.memory_space<vmem>>, %arg4: memref<8x32xf32, #tpu.memory_space<vmem>>) attributes {dimension_semantics = [#tpu.dimension_semantics<parallel>], iteration_bounds = array<i64: 2>, scalar_prefetch = 0 : i64, scratch_operands = 0 : i64, tpu.core_type = #tpu.core_type<tc>, window_params = [{transform_indices = @transform_0, window_bounds = array<i64: 8, 2048>}, {pipeline_mode = #tpu.pipeline_mode<synchronous>, transform_indices = @transform_1, window_bounds = array<i64: 2048, 32>}, {pipeline_mode = #tpu.pipeline_mode<synchronous>, transform_indices = @transform_2, window_bounds = array<i64: 1, 32>}, {transform_indices = @transform_3, window_bounds = array<i64: 8, 32>}]} {
    %c0 = arith.constant 0 : index
    %c0_0 = arith.constant 0 : index
    %0 = vector.load %arg1[%c0, %c0_0] : memref<8x2048xbf16, #tpu.memory_space<vmem>>, vector<8x2048xbf16>
    %c0_1 = arith.constant 0 : index
    %c0_2 = arith.constant 0 : index
    %1 = vector.load %arg2[%c0_1, %c0_2] : memref<2048x32xbf16, #tpu.memory_space<vmem>>, vector<2048x32xbf16>
    %cst = arith.constant dense<0.000000e+00> : vector<8x32xf32>
    %2 = tpu.matmul %0, %1, %cst {dimension_numbers = #tpu.dot_dimension_numbers<[1], [0], [0], [1], [0, 0, 1, 1], [], []>} : vector<8x2048xbf16>, vector<2048x32xbf16>, vector<8x32xf32> -> vector<8x32xf32>
    %c0_3 = arith.constant 0 : index
    %c0_4 = arith.constant 0 : index
    %3 = vector.load %arg3[%c0_3, %c0_4] : memref<1x32xf32, #tpu.memory_space<vmem>>, vector<1x32xf32>
    %4 = vector.broadcast %3 : vector<1x32xf32> to vector<8x32xf32>
    %5 = arith.addf %2, %4 : vector<8x32xf32>
    %c0_5 = arith.constant 0 : index
    %c0_6 = arith.constant 0 : index
    %6 = vector.load %arg4[%c0_5, %c0_6] : memref<8x32xf32, #tpu.memory_space<vmem>>, vector<8x32xf32>
    tpu.vector_store %arg4[%c0_5, %c0_6], %5 {strides = array<i32>} : memref<8x32xf32, #tpu.memory_space<vmem>>, vector<8x32xf32>,
    return
  }
  func.func @transform_0(%arg0: i32) -> (i32, i32) {
    %c0_i32 = arith.constant 0 : i32
    %c0_i32_0 = arith.constant 0 : i32
    return %arg0, %c0_i32 : i32, i32
  }
  func.func @transform_1(%arg0: i32) -> (i32, i32) {
    %c0_i32 = arith.constant 0 : i32
    %c0_i32_0 = arith.constant 0 : i32
    %c0_i32_1 = arith.constant 0 : i32
    return %c0_i32, %c0_i32_0 : i32, i32
  }
  func.func @transform_2(%arg0: i32) -> (i32, i32) {
    %c0_i32 = arith.constant 0 : i32
    %c0_i32_0 = arith.constant 0 : i32
    %c0_i32_1 = arith.constant 0 : i32
    return %c0_i32, %c0_i32_0 : i32, i32
  }
  func.func @transform_3(%arg0: i32) -> (i32, i32) {
    %c0_i32 = arith.constant 0 : i32
    %c0_i32_0 = arith.constant 0 : i32
    return %arg0, %c0_i32 : i32, i32
  }
}

</mosaic_0001>

<bundles_post_ra>
// kernel: patch_embed_forward.1
= control target key start
LH: loop header
LB: loop body
LE: loop exit
PB: predicated region body
PF: predicated region fallthrough
CT: control target
= control target key end

     0   :  { %8 = vsyncpa [#allocation3], 0  ;;  %s2743_s0 = inlined_call_operand.vmem [shape: bf16[16,2048], index: 0, kind: input, shape index: {}]   ;;  %s2744_s1 = inlined_call_operand.vmem [shape: bf16[2048,32], index: 1, kind: input, shape index: {}]   ;;  %s2745_s2 = inlined_call_operand.vmem [shape: f32[1,32], index: 2, kind: input, shape index: {}]   ;;  %s2746_s3 = inlined_call_operand.hbm [shape: f32[16,32], index: 3, kind: output, shape index: {}]  }
   0x1   :  { %10 = vsyncpa [#allocation3 + $0x1], 0  ;;  %s2259_s12 = smov 0   ;;  %s2261_s13 = smov 0  }
   0x2   :  { %s2263_s14 = smov 0   ;;  %s2265_s15 = smov 0  }
   0x3 LB: > { %s2280_s16 = sadd.s32 4294967295, %s2236_s15   ;;  %s1660_s17 = sadd.s32 4294967294, %s2236_s15   ;;  %s2236_s15 = sphi %s2265_s15, %s2752_s15   ;;  %s2232_s14 = sphi %s2263_s14, %s2751_s14   ;;  %s2228_s13 = sphi %s2261_s13, %s2750_s13   ;;  %s2224_s12 = sphi %s2259_s12, %s2749_s12  }
   0x4   : > { %s2284_s18 = sadd.s32 1, %s2236_s15   ;;  %s91_s19 = sadd.s32 1, %s2232_s14 }
   0x5   : > { %s88_s20 = ssub.s32 %s2236_s15, %s2284_s18  ;;  %p101_p0 = scmp.ne.s32.totalorder %s2232_s14, %s2228_s13 }
   0x6   : > { %p89_p1 = scmp.eq.s32.totalorder %s88_s20, 0  ;;  %p102_p2 = scmp.eq.s32.totalorder %s2280_s16, 1 }
   0x7   : > { %p107_p3 = scmp.ne.s32.totalorder %s2228_s13, %s2224_s12  ;;  %p108_p4 = scmp.eq.s32.totalorder %s1660_s17, 1 }
   0x8   : > { %s2295_s21 = scalar_select %p89_p1, %s2232_s14, %s91_s19  }
   0x9   : > { %p2297_p5 = por %p102_p2, %p101_p0  ;;  %p2301_p6 = por %p108_p4, %p107_p3 }
   0xa   : > { %p1663_p7 = scmp.ge.s32.totalorder %s2236_s15, 1  ;;  %p140_p8 = scmp.lt.s32.totalorder %s2236_s15, 3 }
   0xc   : > { %p141_p9 = pnand %p1663_p7, %p140_p8 }
   0xd   : > { %p164_p10 = scmp.lt.s32.totalorder (!%p141_p9), %s2280_s16, 1  ;;  %s1813_s29 = sshll.u32 (!%p141_p9), %s2280_s16, 7 }
   0xe   : > { %144 = sbr.rel (%p141_p9) target bundleno = 363 (0x16b), region = 32 }
  0x13   : > { %v2032_v0 = vld [vmem:[%s2744_s1 + $0x78] sm:$0xff]   ;;  %v2036_v4 = vld [vmem:[%s2744_s1 + $0x70] sm:$0xff]   ;;  %v2040_v8 = vld [vmem:[%s2744_s1 + $0x68] sm:$0xff]   ;;  %s165_s7 = scalar_select %p164_p10, %s2280_s16, 1  ;;  %vm1585_vm0 = vcmask 261120  }
  0x14   : > { %v2033_v1 = vld [vmem:[%s2744_s1 + $0xf8] sm:$0xff]   ;;  %1817 = vmatprep.subr.bf16.mxu0 %v2032_v0  ;;  %v2037_v5 = vld [vmem:[%s2744_s1 + $0xf0] sm:$0xff]   ;;  %v2041_v9 = vld [vmem:[%s2744_s1 + $0xe8] sm:$0xff]   ;;  %s2238_s16 = smov [#allocation2]  }
  0x15   : > { %v2034_v2 = vld [vmem:[%s2744_s1 + $0x38] sm:$0xff]   ;;  %1839 = vmatprep.subr.bf16.mxu1 %v2033_v1  ;;  %v2038_v6 = vld [vmem:[%s2744_s1 + $0x30] sm:$0xff]   ;;  %v2042_v10 = vld [vmem:[%s2744_s1 + $0x28] sm:$0xff]   ;;  %s1816_s25 = sshll.u32 %s165_s7, 6  ;;  %s1599_s7 = scalar_lea.hbm %s2746_s3, %s1813_s29 }
  0x16   : > { %v2035_v3 = vld [vmem:[%s2744_s1 + $0xb8] sm:$0xff]   ;;  %1818 = vmatpush3.bf16.msra.mxu0 %v2034_v2  ;;  %v2039_v7 = vld [vmem:[%s2744_s1 + $0xb0] sm:$0xff]   ;;  %v2043_v11 = vld [vmem:[%s2744_s1 + $0xa8] sm:$0xff]   ;;  %s2402_s8 = scalar_lea.vmem %s2743_s0, %s1816_s25  ;;  %s2180_s11 = sshll.u32 %s2238_s16, 4  ;;  %s2181_s11 = int_to_ptr.vmem [resolvable:$false] %s2180_s11 }
  0x17   : > { %1840 = vmatpush3.bf16.msra.mxu1 %v2035_v3  ;;  %1819 = vmatprep.subr.bf16.mxu0 %v2036_v4  ;;  %v2044_v12 = vld [vmem:[%s2744_s1 + $0x60] sm:$0xff]   ;;  %v2048_v16 = vld [vmem:[%s2744_s1 + $0x58] sm:$0xff]   ;;  %v2052_v20 = vld [vmem:[%s2744_s1 + $0x50] sm:$0xff]   ;;  %s2182_s17 = scalar_lea.vmem %s2181_s11, 256 }
  0x18   : > { %1841 = vmatprep.subr.bf16.mxu1 %v2037_v5  ;;  %v2045_v13 = vld [vmem:[%s2744_s1 + $0xe0] sm:$0xff]   ;;  %v2049_v17 = vld [vmem:[%s2744_s1 + $0xd8] sm:$0xff]   ;;  %v2053_v21 = vld [vmem:[%s2744_s1 + $0xd0] sm:$0xff]  }
  0x19   : > { %v2046_v14 = vld [vmem:[%s2744_s1 + $0x20] sm:$0xff]   ;;  %v2050_v18 = vld [vmem:[%s2744_s1 + $0x18] sm:$0xff]   ;;  %v2054_v22 = vld [vmem:[%s2744_s1 + $0x10] sm:$0xff]  }
  0x1a   : > { %1820 = vmatpush3.bf16.msra.mxu0 %v2038_v6  ;;  %v2047_v15 = vld [vmem:[%s2744_s1 + $0xa0] sm:$0xff]   ;;  %v2051_v19 = vld [vmem:[%s2744_s1 + $0x98] sm:$0xff]   ;;  %v2055_v23 = vld [vmem:[%s2744_s1 + $0x90] sm:$0xff]  }
  0x1b   : > { %1842 = vmatpush3.bf16.msra.mxu1 %v2039_v7  ;;  %1821 = vmatprep.subr.bf16.mxu0 %v2040_v8  ;;  %v2056_v24 = vld [vmem:[%s2744_s1 + $0x48] sm:$0xff]   ;;  %v2060_v28 = vld [vmem:[%s2744_s1 + $0x40] sm:$0xff]   ;;  %v2068_v38 = vld [vmem:[%s2744_s1 + $0x178] sm:$0xff]  }
  0x1c   : > { %1843 = vmatprep.subr.bf16.mxu1 %v2041_v9  ;;  %v2057_v25 = vld [vmem:[%s2744_s1 + $0xc8] sm:$0xff]   ;;  %v2061_v29 = vld [vmem:[%s2744_s1 + $0xc0] sm:$0xff]   ;;  %v2069_v39 = vld [vmem:[%s2744_s1 + $0x1f8] sm:$0xff]  }
  0x1d   : > { %v2058_v26 = vld [vmem:[%s2744_s1 + $0x8] sm:$0xff]   ;;  %v2062_v30 = vld [vmem:[%s2744_s1] sm:$0xff]   ;;  %v2070_v40 = vld [vmem:[%s2744_s1 + $0x138] sm:$0xff]  }
  0x1e   : > { %1822 = vmatpush3.bf16.msra.mxu0 %v2042_v10  ;;  %v2059_v27 = vld [vmem:[%s2744_s1 + $0x88] sm:$0xff]   ;;  %v2063_v31 = vld [vmem:[%s2744_s1 + $0x80] sm:$0xff]   ;;  %v2071_v41 = vld [vmem:[%s2744_s1 + $0x1b8] sm:$0xff]  }
  0x1f   : > { %1844 = vmatpush3.bf16.msra.mxu1 %v2043_v11  ;;  %1823 = vmatprep.subr.bf16.mxu0 %v2044_v12  ;;  %v170_v32 = vld [vmem:[%s2402_s8] sm:$0xff]  ;;  %v171_v33 = vld [vmem:[%s2402_s8 + $0x8] sm:$0xff]  ;;  %v2072_v42 = vld [vmem:[%s2744_s1 + $0x170] sm:$0xff]  }
  0x20   : > { %1845 = vmatprep.subr.bf16.mxu1 %v2045_v13  ;;  %v1668_v34 = vcombine.low %v170_v32, %v170_v32  ;;  %v1669_v35 = vcombine.high %v170_v32, %v170_v32  ;;  %v1670_v36 = vcombine.low %v171_v33, %v171_v33  ;;  %v1671_v37 = vcombine.high %v171_v33, %v171_v33  ;;  %v2073_v43 = vld [vmem:[%s2744_s1 + $0x1f0] sm:$0xff]   ;;  %v2076_v46 = vld [vmem:[%s2744_s1 + $0x168] sm:$0xff]   ;;  %v2080_v50 = vld [vmem:[%s2744_s1 + $0x160] sm:$0xff]  }
  0x21   : > { %v2074_v44 = vld [vmem:[%s2744_s1 + $0x130] sm:$0xff]   ;;  %v2077_v47 = vld [vmem:[%s2744_s1 + $0x1e8] sm:$0xff]   ;;  %v2081_v51 = vld [vmem:[%s2744_s1 + $0x1e0] sm:$0xff]  }
  0x22   : > { %1824 = vmatpush3.bf16.msra.mxu0 %v2046_v14  ;;  %1297 = vmatprep.mubr.bf16.mxu0 %v1669_v35  ;;  %v2075_v45 = vld [vmem:[%s2744_s1 + $0x1b0] sm:$0xff]   ;;  %v2078_v48 = vld [vmem:[%s2744_s1 + $0x128] sm:$0xff]   ;;  %v2082_v52 = vld [vmem:[%s2744_s1 + $0x120] sm:$0xff]  }
  0x23   : > { %1846 = vmatpush3.bf16.msra.mxu1 %v2047_v15  ;;  %1825 = vmatprep.subr.bf16.mxu0 %v2048_v16  ;;  %v2079_v49 = vld [vmem:[%s2744_s1 + $0x1a8] sm:$0xff]   ;;  %v2083_v53 = vld [vmem:[%s2744_s1 + $0x1a0] sm:$0xff]   ;;  %v2084_v54 = vld [vmem:[%s2744_s1 + $0x158] sm:$0xff]  }
  0x24   : > { %1847 = vmatprep.subr.bf16.mxu1 %v2049_v17  ;;  %1337 = vmatprep.mubr.bf16.mxu1 %v1671_v37  ;;  %v2085_v55 = vld [vmem:[%s2744_s1 + $0x1d8] sm:$0xff]   ;;  %v2088_v58 = vld [vmem:[%s2744_s1 + $0x150] sm:$0xff]   ;;  %v2092_v62 = vld [vmem:[%s2744_s1 + $0x148] sm:$0xff]  }
  0x25   : > { %v2086_v56 = vld [vmem:[%s2744_s1 + $0x118] sm:$0xff]   ;;  %v2089_v59 = vld [vmem:[%s2744_s1 + $0x1d0] sm:$0xff]   ;;  %v2093_v63 = vld [vmem:[%s2744_s1 + $0x1c8] sm:$0xff]  }
  0x26   : > { %1826 = vmatpush3.bf16.msra.mxu0 %v2050_v18  ;;  %v2087_v57 = vld [vmem:[%s2744_s1 + $0x198] sm:$0xff]   ;;  %v2090_v60 = vld [vmem:[%s2744_s1 + $0x110] sm:$0xff]   ;;  %v2094_v0 = vld [vmem:[%s2744_s1 + $0x108] sm:$0xff]  }
  0x27   : > { %1848 = vmatpush3.bf16.msra.mxu1 %v2051_v19  ;;  %1827 = vmatprep.subr.bf16.mxu0 %v2052_v20  ;;  %v2091_v61 = vld [vmem:[%s2744_s1 + $0x190] sm:$0xff]   ;;  %v2095_v1 = vld [vmem:[%s2744_s1 + $0x188] sm:$0xff]   ;;  %v2096_v2 = vld [vmem:[%s2744_s1 + $0x140] sm:$0xff]  }
  0x28   : > { %1849 = vmatprep.subr.bf16.mxu1 %v2053_v21  ;;  %v2097_v3 = vld [vmem:[%s2744_s1 + $0x1c0] sm:$0xff]   ;;  %v172_v6 = vld [vmem:[%s2402_s8 + $0x10] sm:$0xff]  ;;  %v173_v9 = vld [vmem:[%s2402_s8 + $0x18] sm:$0xff] }
  0x29   : > { %v2098_v4 = vld [vmem:[%s2744_s1 + $0x100] sm:$0xff]   ;;  %v1672_v7 = vcombine.low %v172_v6, %v172_v6  ;;  %v1673_v8 = vcombine.high %v172_v6, %v172_v6  ;;  %v1674_v10 = vcombine.low %v173_v9, %v173_v9  ;;  %v1675_v11 = vcombine.high %v173_v9, %v173_v9  ;;  %v2104_v12 = vld [vmem:[%s2744_s1 + $0x278] sm:$0xff]   ;;  %v2108_v16 = vld [vmem:[%s2744_s1 + $0x270] sm:$0xff]  }
  0x2a   : > { %1828 = vmatpush3.bf16.msra.mxu0 %v2054_v22  ;;  %v2099_v5 = vld [vmem:[%s2744_s1 + $0x180] sm:$0xff]   ;;  %v2105_v13 = vld [vmem:[%s2744_s1 + $0x2f8] sm:$0xff]   ;;  %v2109_v17 = vld [vmem:[%s2744_s1 + $0x2f0] sm:$0xff]  }
  0x2b   : > { %1850 = vmatpush3.bf16.msra.mxu1 %v2055_v23  ;;  %1829 = vmatprep.subr.bf16.mxu0 %v2056_v24  ;;  %v2106_v14 = vld [vmem:[%s2744_s1 + $0x238] sm:$0xff]   ;;  %v2110_v18 = vld [vmem:[%s2744_s1 + $0x230] sm:$0xff]   ;;  %v2112_v20 = vld [vmem:[%s2744_s1 + $0x268] sm:$0xff]  }
  0x2c   : > { %1851 = vmatprep.subr.bf16.mxu1 %v2057_v25  ;;  %v2107_v15 = vld [vmem:[%s2744_s1 + $0x2b8] sm:$0xff]   ;;  %v2111_v19 = vld [vmem:[%s2744_s1 + $0x2b0] sm:$0xff]   ;;  %v2113_v21 = vld [vmem:[%s2744_s1 + $0x2e8] sm:$0xff]  }
  0x2d   : > { %v2114_v22 = vld [vmem:[%s2744_s1 + $0x228] sm:$0xff]   ;;  %v2116_v24 = vld [vmem:[%s2744_s1 + $0x260] sm:$0xff]   ;;  %v2124_v32 = vld [vmem:[%s2744_s1 + $0x250] sm:$0xff]  }
  0x2e   : > { %1830 = vmatpush3.bf16.msra.mxu0 %v2058_v26  ;;  %v2115_v23 = vld [vmem:[%s2744_s1 + $0x2a8] sm:$0xff]   ;;  %v2117_v25 = vld [vmem:[%s2744_s1 + $0x2e0] sm:$0xff]   ;;  %v2125_v33 = vld [vmem:[%s2744_s1 + $0x2d0] sm:$0xff]  }
  0x2f   : > { %1852 = vmatpush3.bf16.msra.mxu1 %v2059_v27  ;;  %1831 = vmatprep.subr.bf16.mxu0 %v2060_v28  ;;  %v2118_v26 = vld [vmem:[%s2744_s1 + $0x220] sm:$0xff]   ;;  %v2120_v28 = vld [vmem:[%s2744_s1 + $0x258] sm:$0xff]   ;;  %v2127_v35 = vld [vmem:[%s2744_s1 + $0x290] sm:$0xff]  }
  0x30   : > { %1853 = vmatprep.subr.bf16.mxu1 %v2061_v29  ;;  %v2119_v27 = vld [vmem:[%s2744_s1 + $0x2a0] sm:$0xff]   ;;  %v2121_v29 = vld [vmem:[%s2744_s1 + $0x2d8] sm:$0xff]   ;;  %v2129_v37 = vld [vmem:[%s2744_s1 + $0x2c8] sm:$0xff]  }
  0x31   : > { %v2160_v6 = vld [vmem:[%s2744_s1 + $0x350] sm:$0xff]  }
  0x32   : > { %1832 = vmatpush3.bf16.msra.mxu0 %v2062_v30  ;;  %v2122_v30 = vld [vmem:[%s2744_s1 + $0x218] sm:$0xff]   ;;  %v2163_v9 = vld [vmem:[%s2744_s1 + $0x390] sm:$0xff]  }
  0x33   : > { %1854 = vmatpush3.bf16.msra.mxu1 %v2063_v31  ;;  %1861 = vmatprep.subr.bf16.mxu0 %v2068_v38  ;;  %v2123_v31 = vld [vmem:[%s2744_s1 + $0x298] sm:$0xff]   ;;  %v2130_v38 = vld [vmem:[%s2744_s1 + $0x208] sm:$0xff]  }
  0x34   : > { %1883 = vmatprep.subr.bf16.mxu1 %v2069_v39  ;;  %v2131_v39 = vld [vmem:[%s2744_s1 + $0x288] sm:$0xff]  }
  0x35   : > { %1298 = vmatmul.mubr.bf16.vlgmr.msra.gmra.mxu0 %v1668_v34  ;;  %v2126_v34 = vld [vmem:[%s2744_s1 + $0x210] sm:$0xff]  }
  0x36   : > { %1338 = vmatmul.mubr.bf16.vlgmr.msra.gmra.mxu1 %v1670_v36  ;;  %1862 = vmatpush3.bf16.msra.mxu0 %v2070_v40  ;;  %v2128_v36 = vld [vmem:[%s2744_s1 + $0x248] sm:$0xff]   ;;  %v2132_v40 = vld [vmem:[%s2744_s1 + $0x240] sm:$0xff]  }
  0x37   : > { %1884 = vmatpush3.bf16.msra.mxu1 %v2071_v41  ;;  %1863 = vmatprep.subr.bf16.mxu0 %v2072_v42  ;;  %v2133_v41 = vld [vmem:[%s2744_s1 + $0x2c0] sm:$0xff]  }
  0x38   : > { %1885 = vmatprep.subr.bf16.mxu1 %v2073_v43  ;;  %1377 = vmatprep.mubr.bf16.mxu0 %v1673_v8  ;;  %v2134_v42 = vld [vmem:[%s2744_s1 + $0x200] sm:$0xff]   ;;  %v2162_v8 = vld [vmem:[%s2744_s1 + $0x310] sm:$0xff]  }
  0x39   : > { %1417 = vmatprep.mubr.bf16.mxu1 %v1675_v11  ;;  %v2135_v43 = vld [vmem:[%s2744_s1 + $0x280] sm:$0xff]   ;;  %v2165_v11 = vld [vmem:[%s2744_s1 + $0x3c8] sm:$0xff]  }
  0x3a   : > { %1864 = vmatpush3.bf16.msra.mxu0 %v2074_v44  ;;  %v174_v44 = vld [vmem:[%s2402_s8 + $0x20] sm:$0xff] }
  0x3b   : > { %1886 = vmatpush3.bf16.msra.mxu1 %v2075_v45  ;;  %1865 = vmatprep.subr.bf16.mxu0 %v2076_v46  ;;  %v175_v45 = vld [vmem:[%s2402_s8 + $0x28] sm:$0xff]  ;;  %v1676_v46 = vcombine.low %v174_v44, %v174_v44 }
  0x3c   : > { %1887 = vmatprep.subr.bf16.mxu1 %v2077_v47  ;;  %v1677_v47 = vcombine.high %v174_v44, %v174_v44 }
  0x3e   : > { %1866 = vmatpush3.bf16.msra.mxu0 %v2078_v48  ;;  %v1678_v48 = vcombine.low %v175_v45, %v175_v45 }
  0x3f   : > { %1888 = vmatpush3.bf16.msra.mxu1 %v2079_v49  ;;  %1867 = vmatprep.subr.bf16.mxu0 %v2080_v50  ;;  %v1679_v49 = vcombine.high %v175_v45, %v175_v45  ;;  %v2140_v50 = vld [vmem:[%s2744_s1 + $0x378] sm:$0xff]  }
  0x40   : > { %1889 = vmatprep.subr.bf16.mxu1 %v2081_v51  ;;  %v2141_v51 = vld [vmem:[%s2744_s1 + $0x3f8] sm:$0xff]  }
  0x42   : > { %1868 = vmatpush3.bf16.msra.mxu0 %v2082_v52  ;;  %v2142_v52 = vld [vmem:[%s2744_s1 + $0x338] sm:$0xff]  }
  0x43   : > { %1890 = vmatpush3.bf16.msra.mxu1 %v2083_v53  ;;  %1869 = vmatprep.subr.bf16.mxu0 %v2084_v54  ;;  %v2143_v53 = vld [vmem:[%s2744_s1 + $0x3b8] sm:$0xff]   ;;  %v2144_v54 = vld [vmem:[%s2744_s1 + $0x370] sm:$0xff]  }
  0x44   : > { %1891 = vmatprep.subr.bf16.mxu1 %v2085_v55  ;;  %v2145_v55 = vld [vmem:[%s2744_s1 + $0x3f0] sm:$0xff]  }
  0x46   : > { %1870 = vmatpush3.bf16.msra.mxu0 %v2086_v56  ;;  %v2146_v56 = vld [vmem:[%s2744_s1 + $0x330] sm:$0xff]  }
  0x47   : > { %1892 = vmatpush3.bf16.msra.mxu1 %v2087_v57  ;;  %1871 = vmatprep.subr.bf16.mxu0 %v2088_v58  ;;  %v2147_v57 = vld [vmem:[%s2744_s1 + $0x3b0] sm:$0xff]   ;;  %v2148_v58 = vld [vmem:[%s2744_s1 + $0x368] sm:$0xff]  }
  0x48   : > { %1893 = vmatprep.subr.bf16.mxu1 %v2089_v59  ;;  %v2149_v59 = vld [vmem:[%s2744_s1 + $0x3e8] sm:$0xff]  }
  0x4a   : > { %1872 = vmatpush3.bf16.msra.mxu0 %v2090_v60  ;;  %v2150_v60 = vld [vmem:[%s2744_s1 + $0x328] sm:$0xff]  }
  0x4b   : > { %1894 = vmatpush3.bf16.msra.mxu1 %v2091_v61  ;;  %1873 = vmatprep.subr.bf16.mxu0 %v2092_v62  ;;  %v2151_v61 = vld [vmem:[%s2744_s1 + $0x3a8] sm:$0xff]   ;;  %v2152_v62 = vld [vmem:[%s2744_s1 + $0x360] sm:$0xff]  }
  0x4c   : > { %1895 = vmatprep.subr.bf16.mxu1 %v2093_v63  ;;  %v2153_v63 = vld [vmem:[%s2744_s1 + $0x3e0] sm:$0xff]  }
  0x4e   : > { %1874 = vmatpush3.bf16.msra.mxu0 %v2094_v0  ;;  %v2154_v0 = vld [vmem:[%s2744_s1 + $0x320] sm:$0xff]  }
  0x4f   : > { %1896 = vmatpush3.bf16.msra.mxu1 %v2095_v1  ;;  %1875 = vmatprep.subr.bf16.mxu0 %v2096_v2  ;;  %v2155_v1 = vld [vmem:[%s2744_s1 + $0x3a0] sm:$0xff]   ;;  %v2156_v2 = vld [vmem:[%s2744_s1 + $0x358] sm:$0xff]  }
  0x50   : > { %1897 = vmatprep.subr.bf16.mxu1 %v2097_v3  ;;  %v2157_v3 = vld [vmem:[%s2744_s1 + $0x3d8] sm:$0xff]  }
  0x52   : > { %1876 = vmatpush3.bf16.msra.mxu0 %v2098_v4  ;;  %v2158_v4 = vld [vmem:[%s2744_s1 + $0x318] sm:$0xff]  }
  0x53   : > { %1898 = vmatpush3.bf16.msra.mxu1 %v2099_v5  ;;  %1905 = vmatprep.subr.bf16.mxu0 %v2104_v12  ;;  %v2159_v5 = vld [vmem:[%s2744_s1 + $0x398] sm:$0xff]   ;;  %v2166_v12 = vld [vmem:[%s2744_s1 + $0x308] sm:$0xff]  }
  0x54   : > { %1927 = vmatprep.subr.bf16.mxu1 %v2105_v13  ;;  %v2167_v13 = vld [vmem:[%s2744_s1 + $0x388] sm:$0xff]  }
  0x55   : > { %1378 = vmatmul.mubr.bf16.vlgmr.msra.gmra.mxu0 %v1672_v7  ;;  %v2161_v7 = vld [vmem:[%s2744_s1 + $0x3d0] sm:$0xff]  }
  0x56   : > { %1418 = vmatmul.mubr.bf16.vlgmr.msra.gmra.mxu1 %v1674_v10  ;;  %1906 = vmatpush3.bf16.msra.mxu0 %v2106_v14  ;;  %v2164_v10 = vld [vmem:[%s2744_s1 + $0x348] sm:$0xff]   ;;  %v2168_v14 = vld [vmem:[%s2744_s1 + $0x340] sm:$0xff]  }
  0x57   : > { %1928 = vmatpush3.bf16.msra.mxu1 %v2107_v15  ;;  %1907 = vmatprep.subr.bf16.mxu0 %v2108_v16  ;;  %v2169_v15 = vld [vmem:[%s2744_s1 + $0x3c0] sm:$0xff]  }
  0x58   : > { %1929 = vmatprep.subr.bf16.mxu1 %v2109_v17  ;;  %1457 = vmatprep.mubr.bf16.mxu0 %v1677_v47  ;;  %v2170_v16 = vld [vmem:[%s2744_s1 + $0x300] sm:$0xff]  }
  0x59   : > { %1497 = vmatprep.mubr.bf16.mxu1 %v1679_v49  ;;  %v2171_v17 = vld [vmem:[%s2744_s1 + $0x380] sm:$0xff]  }
  0x5a   : > { %1908 = vmatpush3.bf16.msra.mxu0 %v2110_v18  ;;  %v176_v18 = vld [vmem:[%s2402_s8 + $0x30] sm:$0xff] }
  0x5b   : > { %1930 = vmatpush3.bf16.msra.mxu1 %v2111_v19  ;;  %1909 = vmatprep.subr.bf16.mxu0 %v2112_v20  ;;  %v177_v19 = vld [vmem:[%s2402_s8 + $0x38] sm:$0xff]  ;;  %v1680_v20 = vcombine.low %v176_v18, %v176_v18  ;;  %s161_s8 = sand.u32 1, %s2228_s13  }
  0x5c   : > { %1931 = vmatprep.subr.bf16.mxu1 %v2113_v21  ;;  %v1681_v21 = vcombine.high %v176_v18, %v176_v18  ;;  %s1664_s28 = sshll.u32 %s161_s8, 3  ;;  %s1588_s9 = scalar_lea.sflag [#allocation3], %s161_s8 }
  0x5d   : > { %s163_s30 = scalar_lea.vmem [#allocation2], %s1664_s28 }
  0x5e   : > { %1910 = vmatpush3.bf16.msra.mxu0 %v2114_v22  ;;  %v1682_v22 = vcombine.low %v177_v19, %v177_v19  ;;  %s1601_s4 = sshll.u32 %s163_s30, 4  ;;  %s1602_s4 = int_to_ptr.vmem [resolvable:$true] %s1601_s4 }
  0x5f   : > { %1932 = vmatpush3.bf16.msra.mxu1 %v2115_v23  ;;  %1911 = vmatprep.subr.bf16.mxu0 %v2116_v24  ;;  %v1683_v23 = vcombine.high %v177_v19, %v177_v19  ;;  %s2176_s10 = scalar_lea.vmem %s1602_s4, 128  ;;  %p2183_p0 = scmp.lt.s32.totalorder %s1602_s4, %s2181_s11 }
  0x60   : > { %1933 = vmatprep.subr.bf16.mxu1 %v2117_v25  ;;  %p2177_p11 = scmp.ne.s32.totalorder %s1602_s4, %s2176_s10  ;;  %p2184_p1 = scmp.lt.s32.totalorder %s2182_s17, %s2176_s10 }
  0x62   : > { %1912 = vmatpush3.bf16.msra.mxu0 %v2118_v26  ;;  %v1667_v26 = vld [vmem:[%s2745_s2] ss:$0 sm:$0xff]  ;;  %p2178_p12 = pnand %p2177_p11, %p2297_p5  ;;  %p2185_p2 = por %p2184_p1, %p2183_p0 }
  0x63   : > { %1934 = vmatpush3.bf16.msra.mxu1 %v2119_v27  ;;  %1913 = vmatprep.subr.bf16.mxu0 %v2120_v28 }
  0x64   : > { %1935 = vmatprep.subr.bf16.mxu1 %v2121_v29  ;;  %p2179_p13 = pneg %p2178_p12 }
  0x66   : > { %1914 = vmatpush3.bf16.msra.mxu0 %v2122_v30  ;;  %p2186_p3 = pnand %p2185_p2, %p2179_p13 }
  0x67   : > { %1936 = vmatpush3.bf16.msra.mxu1 %v2123_v31  ;;  %1915 = vmatprep.subr.bf16.mxu0 %v2124_v32 }
  0x68   : > { %1937 = vmatprep.subr.bf16.mxu1 %v2125_v33 }
  0x6a   : > { %1916 = vmatpush3.bf16.msra.mxu0 %v2126_v34 }
  0x6b   : > { %1938 = vmatpush3.bf16.msra.mxu1 %v2127_v35  ;;  %1917 = vmatprep.subr.bf16.mxu0 %v2128_v36 }
  0x6c   : > { %1939 = vmatprep.subr.bf16.mxu1 %v2129_v37 }
  0x6e   : > { %1918 = vmatpush3.bf16.msra.mxu0 %v2130_v38 }
  0x6f   : > { %1940 = vmatpush3.bf16.msra.mxu1 %v2131_v39  ;;  %1919 = vmatprep.subr.bf16.mxu0 %v2132_v40 }
  0x70   : > { %1941 = vmatprep.subr.bf16.mxu1 %v2133_v41 }
  0x72   : > { %1920 = vmatpush3.bf16.msra.mxu0 %v2134_v42 }
  0x73   : > { %1942 = vmatpush3.bf16.msra.mxu1 %v2135_v43  ;;  %1949 = vmatprep.subr.bf16.mxu0 %v2140_v50 }
  0x74   : > { %1971 = vmatprep.subr.bf16.mxu1 %v2141_v51 }
  0x75   : > { %1458 = vmatmul.mubr.bf16.vlgmr.msra.gmra.mxu0 %v1676_v46 }
  0x76   : > { %1498 = vmatmul.mubr.bf16.vlgmr.msra.gmra.mxu1 %v1678_v48  ;;  %1950 = vmatpush3.bf16.msra.mxu0 %v2142_v52 }
  0x77   : > { %1972 = vmatpush3.bf16.msra.mxu1 %v2143_v53  ;;  %1951 = vmatprep.subr.bf16.mxu0 %v2144_v54 }
  0x78   : > { %1973 = vmatprep.subr.bf16.mxu1 %v2145_v55  ;;  %1537 = vmatprep.mubr.bf16.mxu0 %v1681_v21 }
  0x79   : > { %1577 = vmatprep.mubr.bf16.mxu1 %v1683_v23 }
  0x7a   : > { %1952 = vmatpush3.bf16.msra.mxu0 %v2146_v56 }
  0x7b   : > { %1974 = vmatpush3.bf16.msra.mxu1 %v2147_v57  ;;  %1953 = vmatprep.subr.bf16.mxu0 %v2148_v58 }
  0x7c   : > { %1975 = vmatprep.subr.bf16.mxu1 %v2149_v59 }
  0x7e   : > { %1954 = vmatpush3.bf16.msra.mxu0 %v2150_v60 }
  0x7f   : > { %1976 = vmatpush3.bf16.msra.mxu1 %v2151_v61  ;;  %1955 = vmatprep.subr.bf16.mxu0 %v2152_v62 }
  0x80   : > { %1977 = vmatprep.subr.bf16.mxu1 %v2153_v63 }
  0x82   : > { %1956 = vmatpush3.bf16.msra.mxu0 %v2154_v0 }
  0x83   : > { %1978 = vmatpush3.bf16.msra.mxu1 %v2155_v1  ;;  %1957 = vmatprep.subr.bf16.mxu0 %v2156_v2 }
  0x84   : > { %1979 = vmatprep.subr.bf16.mxu1 %v2157_v3 }
  0x86   : > { %1958 = vmatpush3.bf16.msra.mxu0 %v2158_v4 }
  0x87   : > { %1980 = vmatpush3.bf16.msra.mxu1 %v2159_v5  ;;  %1959 = vmatprep.subr.bf16.mxu0 %v2160_v6 }
  0x88   : > { %1981 = vmatprep.subr.bf16.mxu1 %v2161_v7 }
  0x8a   : > { %1960 = vmatpush3.bf16.msra.mxu0 %v2162_v8 }
  0x8b   : > { %1982 = vmatpush3.bf16.msra.mxu1 %v2163_v9  ;;  %1961 = vmatprep.subr.bf16.mxu0 %v2164_v10 }
  0x8c   : > { %1983 = vmatprep.subr.bf16.mxu1 %v2165_v11 }
  0x8e   : > { %1962 = vmatpush3.bf16.msra.mxu0 %v2166_v12 }
  0x8f   : > { %1984 = vmatpush3.bf16.msra.mxu1 %v2167_v13  ;;  %1963 = vmatprep.subr.bf16.mxu0 %v2168_v14 }
  0x90   : > { %1985 = vmatprep.subr.bf16.mxu1 %v2169_v15 }
  0x92   : > { %1964 = vmatpush3.bf16.msra.mxu0 %v2170_v16 }
  0x93   : > { %1986 = vmatpush3.bf16.msra.mxu1 %v2171_v17 }
  0x95   : > { %1538 = vmatmul.mubr.bf16.vlgmr.msra.gmra.mxu0 %v1680_v20 }
  0x96   : > { %1578 = vmatmul.mubr.bf16.vlgmr.msra.gmra.mxu1 %v1682_v22 }
  0xf5   : > { %v1833_v24 = vpop.f32.mrf.mxu0 }
  0xf6   : > { %v1855_v25 = vpop.f32.mrf.mxu1 }
  0xf7   : > { %v1834_v27 = vpop.f32.mrf.mxu0 }
  0xf8   : > { %v1856_v28 = vpop.f32.mrf.mxu1  ;;  %v1835_v29 = vadd.f32 %v1834_v27, %v1833_v24 }
  0xf9   : > { %v1857_v30 = vadd.f32 %v1856_v28, %v1855_v25  ;;  %v1836_v31 = vpop.f32.mrf.mxu0 }
  0xfa   : > { %v1858_v32 = vpop.f32.mrf.mxu1  ;;  %v1300_v33 = vadd.f32 %v1835_v29, %v1667_v26 }
  0xfb   : > { %v1837_v34 = vpop.f32.mrf.mxu0 }
  0xfc   : > { %v1859_v35 = vpop.f32.mrf.mxu1  ;;  %v1340_v36 = vadd.f32 %v1857_v30, %v1300_v33 }
 0x115   : > { %v1877_v37 = vpop.f32.mrf.mxu0 }
 0x116   : > { %v1899_v38 = vpop.f32.mrf.mxu1 }
 0x117   : > { %v1878_v39 = vpop.f32.mrf.mxu0 }
 0x118   : > { %v1900_v40 = vpop.f32.mrf.mxu1  ;;  %v1879_v53 = vadd.f32 %v1878_v39, %v1877_v37 }
 0x119   : > { %v1880_v41 = vpop.f32.mrf.mxu0  ;;  %v1901_v55 = vadd.f32 %v1900_v40, %v1899_v38 }
 0x11a   : > { %v1902_v42 = vpop.f32.mrf.mxu1  ;;  %v1380_v54 = vadd.f32 %v1879_v53, %v1340_v36 }
 0x11b   : > { %v1881_v43 = vpop.f32.mrf.mxu0 }
 0x11c   : > { %v1903_v44 = vpop.f32.mrf.mxu1  ;;  %v1420_v57 = vadd.f32 %v1901_v55, %v1380_v54 }
 0x135   : > { %v1921_v45 = vpop.f32.mrf.mxu0 }
 0x136   : > { %v1943_v46 = vpop.f32.mrf.mxu1 }
 0x137   : > { %v1922_v47 = vpop.f32.mrf.mxu0 }
 0x138   : > { %v1944_v48 = vpop.f32.mrf.mxu1  ;;  %v1923_v56 = vadd.f32 %v1922_v47, %v1921_v45 }
 0x139   : > { %v1924_v49 = vpop.f32.mrf.mxu0  ;;  %v1945_v59 = vadd.f32 %v1944_v48, %v1943_v46 }
 0x13a   : > { %v1946_v50 = vpop.f32.mrf.mxu1  ;;  %v1460_v58 = vadd.f32 %v1923_v56, %v1420_v57 }
 0x13b   : > { %v1925_v51 = vpop.f32.mrf.mxu0 }
 0x13c   : > { %v1947_v52 = vpop.f32.mrf.mxu1  ;;  %v1500_v63 = vadd.f32 %v1945_v59, %v1460_v58 }
 0x155   : > { %v1965_v60 = vpop.f32.mrf.mxu0 }
 0x156   : > { %v1987_v61 = vpop.f32.mrf.mxu1 }
 0x157   : > { %v1966_v62 = vpop.f32.mrf.mxu0 }
 0x158   : > { %v1967_v0 = vadd.f32 %v1966_v62, %v1965_v60  ;;  %v1988_v1 = vpop.f32.mrf.mxu1 }
 0x159   : > { %v1968_v2 = vpop.f32.mrf.mxu0  ;;  %v1989_v4 = vadd.f32 %v1988_v1, %v1987_v61 }
 0x15a   : > { %v1540_v3 = vadd.f32 %v1967_v0, %v1500_v63  ;;  %v1990_v5 = vpop.f32.mrf.mxu1 }
 0x15b   : > { %v1969_v6 = vpop.f32.mrf.mxu0 }
 0x15c   : > { %v1580_v7 = vadd.f32 %v1989_v4, %v1540_v3  ;;  %v1991_v8 = vpop.f32.mrf.mxu1 }
 0x15e   : > { %1586 = vst.msk [vmem:[%s163_s30] sm:$0xff] %vm1585_vm0, %v1580_v7 }
 0x15f   : > { %2189 = shalt.err (!%p2186_p3)
}
 0x160   : > { %s2190_s19 = scalar_lea.hbm %s1599_s7, 128  ;;  %s2194_s25 = scalar_lea.hbm %s2746_s3, 256 }
 0x161   : > { %p2191_p4 = scmp.ne.s32.totalorder %s1599_s7, %s2190_s19  ;;  %p2195_p9 = scmp.lt.s32.totalorder %s1599_s7, %s2746_s3 }
 0x162   : > { %p2196_p10 = scmp.lt.s32.totalorder %s2194_s25, %s2190_s19 }
 0x163   : > { %p2192_p7 = pnand %p2191_p4, %p2297_p5 }
 0x164   : > { %p2197_p11 = por %p2196_p10, %p2195_p9 }
 0x165   : > { %p2193_p8 = pneg %p2192_p7 }
 0x167   : > { %p2198_p12 = pnand %p2197_p11, %p2193_p8 }
 0x169   : > { %2201 = shalt.err (!%p2198_p12)
}
 0x16a   : > { %1993 = dma.vmem_to_hbm [thread:$0]  (%p2297_p5), %s1602_s4, 128, %s1599_s7, %s1588_s9  }
 0x16b PF: > { %p1999_p13 = scmp.ge.s32.totalorder %s2236_s15, 2  ;;  %s1613_s8 = sand.u32 1, %s2224_s12  }
 0x16c   : > { %s1614_s28 = scalar_lea.sflag [#allocation3], %s1613_s8 }
 0x16d   : > { %p1996_p0 = pnand %p1999_p13, %p2301_p6 }
 0x16f   : > { %p1997_p1 = pneg %p1996_p0 }
 0x171   : > { %2219 = dma.done.wait (%p1997_p1), %s1614_s28, 128  }
 0x172   : > { %2221 = vsyncadd (%p1997_p1), %s1614_s28, 4294967168  ;;  %p13_p2 = scmp.ge.s32.totalorder %s2284_s18, 4   ;;  %s2749_s12 = smov %s2228_s13 }
 0x173   : > { %s2750_s13 = smov %s2232_s14  ;;  %s2751_s14 = smov %s2295_s21 }
 0x174   : > { %s2752_s15 = smov %s2284_s18  ;;  %15 = sbr.rel (!%p13_p2) target bundleno = 3 (0x3), region = 67 }
 0x179   :  { %1619 = vsyncpa [#allocation3], 1 }
 0x17a   :  { %1621 = vsyncpa [#allocation3 + $0x1], 1 }

</bundles_post_ra>
